<compile_context>
chip_gen: v7x
topology: tpu7x:2x2x1
jax: 0.10.0
libtpu: 0.0.40
codegen_flags: <defaults>
</compile_context>

<pallas_src>
import math

import jax
import jax.numpy as jnp
from jax.experimental import pallas as pl
from jax.experimental.pallas import tpu as pltpu


def _round_up(a: int, b: int) -> int:
    return ((a + b - 1) // b) * b


def _sublane_multiple(dtype) -> int:
    # f32 -> 8, bf16 -> 16, int8/fp8 -> 32 (sub-32-bit dtypes pack along sublanes).
    return max(8, 32 // jnp.dtype(dtype).itemsize)


def _vmem_capacity_bytes() -> int:
    try:
        info = pltpu.get_tpu_info()
        cap = getattr(info, "vmem_capacity_bytes", None)
        if cap:
            return int(cap)
    except Exception:
        pass
    return 64 * 1024 * 1024  # conservative: v7x per-TensorCore VMEM


def _lowrank_kernel_bias(x_ref, w1_ref, w2_ref, b_ref, o_ref):
    # x_ref : (tm, d_in), w1_ref: (d_in, d_rank), w2_ref: (d_rank, tn)
    # b_ref : (1, tn) f32, o_ref: (tm, tn)
    x = x_ref[...]
    h = jnp.dot(x, w1_ref[...], preferred_element_type=jnp.float32)
    y = jnp.dot(h.astype(x.dtype), w2_ref[...], preferred_element_type=jnp.float32)
    o_ref[...] = (y + b_ref[...]).astype(o_ref.dtype)


def _lowrank_kernel_nobias(x_ref, w1_ref, w2_ref, o_ref):
    x = x_ref[...]
    h = jnp.dot(x, w1_ref[...], preferred_element_type=jnp.float32)
    y = jnp.dot(h.astype(x.dtype), w2_ref[...], preferred_element_type=jnp.float32)
    o_ref[...] = y.astype(o_ref.dtype)


def low_rank_linear(x, w1, w2, b=None, *, block_rows=None, block_cols=None):
    """JAX/Pallas equivalent of LowRankLinear.forward.

    x : (..., d_in)
    w1: (d_rank, d_in)   -- PyTorch linear1.weight
    w2: (d_out, d_rank)  -- PyTorch linear2.weight
    b : (d_out,) or None -- PyTorch linear2.bias
    """
    *lead, d_in = x.shape
    d_rank, d_in_w = w1.shape
    assert d_in_w == d_in, (d_in_w, d_in)
    d_out, d_rank_w = w2.shape
    assert d_rank_w == d_rank, (d_rank_w, d_rank)

    # Flatten leading dims -> lane-dense 2-D problem (free reshape on contiguous x).
    m = 1
    for s in lead:
        m *= s
    x2 = x.reshape(m, d_in)

    # Weight layout plumbing done once in the wrapper (not per grid step).
    w1_t = jnp.transpose(w1)          # (d_in, d_rank)
    w2_t = jnp.transpose(w2)          # (d_rank, d_out)
    has_bias = b is not None
    if has_bias:
        b2 = jnp.reshape(b, (1, d_out)).astype(jnp.float32)   # f32 epilogue add

    dtype = x2.dtype
    itemsize = jnp.dtype(dtype).itemsize
    sub = _sublane_multiple(dtype)

    # ---- VMEM budgeting (per generation, via physical capacity query) ----
    DB = 2                                         # double-buffer factor
    vmem_phys = _vmem_capacity_bytes()
    vmem_budget = int(vmem_phys * 0.70)            # headroom for compiler scratch

    w1_bytes = d_in * d_rank * itemsize
    w2_bytes = d_rank * d_out * itemsize
    b_bytes = d_out * 4 if has_bias else 0

    # Column tile (tn): keep W2^T fully resident when it fits comfortably,
    # otherwise split d_out into lane-dense multiples of 128.
    weight_budget = vmem_budget // 2
    if block_cols is not None:
        tn = min(d_out, max(128, _round_up(block_cols, 128)))
    elif d_out <= 128 or DB * (w1_bytes + w2_bytes + b_bytes) <= weight_budget:
        tn = d_out
    else:
        per_col = d_rank * itemsize + (4 if has_bias else 0)
        tn = max(0, weight_budget // DB - w1_bytes) // max(1, per_col)
        tn = max(128, (tn // 128) * 128)
        tn = min(tn, d_out)
    n_cols = pl.cdiv(d_out, tn)

    resident = DB * (w1_bytes + d_rank * tn * itemsize + (tn * 4 if has_bias else 0))
    tile_budget = max(0, vmem_budget - resident)
    # TODO(synk): for very large d_in where even W1^T alone overflows the VMEM
    # budget, add a trailing 'arbitrary' grid axis over d_in chunks with an
    # h-accumulator in VMEM scratch instead of shrinking the row tile.

    # Row tile (tm): cap on bytes, not rows; round to the dtype sublane multiple.
    if block_rows is not None:
        tm = max(sub, _round_up(block_rows, sub))
    else:
        tm_vmem = tile_budget // max(1, DB * (d_in + tn) * itemsize)
        tm_target = (8 * 1024 * 1024) // max(1, max(d_in, tn) * itemsize)
        tm = min(tm_vmem, tm_target)
        tm = max(sub, (tm // sub) * sub)

    m_ceil = _round_up(max(m, 1), sub)
    tm = min(tm, m_ceil)
    if block_rows is None:
        # Keep >=2 (ideally 4) row tiles so the 'parallel' axis can shard across
        # TensorCores (v7x megacore) and pipelining has steps to overlap.
        if m_ceil >= 4 * sub:
            tm = min(tm, _round_up(pl.cdiv(m_ceil, 4), sub))
        elif m_ceil >= 2 * sub:
            tm = min(tm, _round_up(pl.cdiv(m_ceil, 2), sub))
    tm = max(sub, tm)
    n_rows = pl.cdiv(m, tm)   # ragged last block handled by Pallas (no jnp.pad)

    needed = resident + DB * (tm * d_in + tm * tn) * itemsize
    vmem_limit = int(min(vmem_phys, max(needed + (16 << 20), 32 << 20)))

    flops = 2 * m * d_rank * (d_in + d_out) + (m * d_out if has_bias else 0)
    bytes_accessed = (m * d_in + m * d_out) * itemsize + w1_bytes + w2_bytes + b_bytes
    cost = pl.CostEstimate(flops=flops, transcendentals=0,
                           bytes_accessed=bytes_accessed)

    in_specs = [
        pl.BlockSpec((tm, d_in), lambda i, j: (i, 0)),        # x row tile
        pl.BlockSpec((d_in, d_rank), lambda i, j: (0, 0)),    # W1^T (resident)
        pl.BlockSpec((d_rank, tn), lambda i, j: (0, j)),      # W2^T (col tile / resident)
    ]
    operands = [x2, w1_t, w2_t]
    if has_bias:
        in_specs.append(pl.BlockSpec((1, tn), lambda i, j: (0, j)))   # bias (f32)
        operands.append(b2)
        kernel = _lowrank_kernel_bias
    else:
        kernel = _lowrank_kernel_nobias

    out = pl.pallas_call(
        kernel,
        out_shape=jax.ShapeDtypeStruct((m, d_out), dtype),
        grid=(n_rows, n_cols),
        in_specs=in_specs,
        out_specs=pl.BlockSpec((tm, tn), lambda i, j: (i, j)),
        compiler_params=pltpu.CompilerParams(
            dimension_semantics=("parallel", "parallel"),
            vmem_limit_bytes=vmem_limit,
        ),
        cost_estimate=cost,
    )(*operands)

    return out.reshape(*lead, d_out)


# TODO(synk): LowRankLinear.update() is host-side parameter surgery (rank
# growth by zero-padding weights); it is not a forward-pass op and has no
# kernel equivalent — handle it at the parameter/pytree level in JAX.


def _reference(x, w1, w2, b):
    h = x.astype(jnp.float32) @ w1.astype(jnp.float32).T
    y = h @ w2.astype(jnp.float32).T
    if b is not None:
        y = y + b.astype(jnp.float32)
    return y


if __name__ == "__main__":
    key = jax.random.PRNGKey(0)
    k1, k2, k3, k4 = jax.random.split(key, 4)

    B, S, D_IN, D_RANK, D_OUT = 2, 8, 32, 8, 32
    x = jax.random.normal(k1, (B, S, D_IN), dtype=jnp.float32)
    # PyTorch-layout weights.
    w1 = jax.random.normal(k2, (D_RANK, D_IN), dtype=jnp.float32) / math.sqrt(D_IN)
    w2 = jax.random.normal(k3, (D_OUT, D_RANK), dtype=jnp.float32) / math.sqrt(D_RANK)
    b = 0.1 * jax.random.normal(k4, (D_OUT,), dtype=jnp.float32)

    # bias=True path (f32)
    out = jax.block_until_ready(low_rank_linear(x, w1, w2, b))
    ref = _reference(x, w1, w2, b)
    assert out.shape == ref.shape
    err = float(jnp.max(jnp.abs(out - ref)))
    assert err < 1e-5, f"bias=True max abs err {err}"

    # bias=False path (f32)
    out_nb = jax.block_until_ready(low_rank_linear(x, w1, w2, None))
    ref_nb = _reference(x, w1, w2, None)
    err_nb = float(jnp.max(jnp.abs(out_nb - ref_nb)))
    assert err_nb < 1e-5, f"bias=False max abs err {err_nb}"

    # bf16 path (exercises the 16-row sublane tiling; loose tolerance).
    xb = x.astype(jnp.bfloat16)
    w1b = w1.astype(jnp.bfloat16)
    w2b = w2.astype(jnp.bfloat16)
    out_bf = jax.block_until_ready(low_rank_linear(xb, w1b, w2b, b))
    ref_bf = _reference(xb, w1b, w2b, b)
    err_bf = float(jnp.max(jnp.abs(out_bf.astype(jnp.float32) - ref_bf)))
    assert out_bf.dtype == jnp.bfloat16
    assert err_bf < 0.15, f"bf16 max abs err {err_bf}"

    print("KERNEL_OK")
</pallas_src>

<mosaic_0001>
module attributes {stable_mosaic.version = 11 : i64} {
  func.func @_lowrank_kernel_bias(%arg0: i32, %arg1: i32, %arg2: memref<8x32xf32, #tpu.memory_space<vmem>>, %arg3: memref<32x8xf32, #tpu.memory_space<vmem>>, %arg4: memref<8x32xf32, #tpu.memory_space<vmem>>, %arg5: memref<1x32xf32, #tpu.memory_space<vmem>>, %arg6: memref<8x32xf32, #tpu.memory_space<vmem>>) attributes {dimension_semantics = [#tpu.dimension_semantics<parallel>, #tpu.dimension_semantics<parallel>], iteration_bounds = array<i64: 2, 1>, scalar_prefetch = 0 : i64, scratch_operands = 0 : i64, tpu.core_type = #tpu.core_type<tc>, window_params = [{transform_indices = @transform_0, window_bounds = array<i64: 8, 32>}, {pipeline_mode = #tpu.pipeline_mode<synchronous>, transform_indices = @transform_1, window_bounds = array<i64: 32, 8>}, {transform_indices = @transform_2, window_bounds = array<i64: 8, 32>}, {transform_indices = @transform_3, window_bounds = array<i64: 1, 32>}, {transform_indices = @transform_4, window_bounds = array<i64: 8, 32>}]} {
    %c0 = arith.constant 0 : index
    %c0_0 = arith.constant 0 : index
    %0 = vector.load %arg2[%c0, %c0_0] : memref<8x32xf32, #tpu.memory_space<vmem>>, vector<8x32xf32>
    %c0_1 = arith.constant 0 : index
    %c0_2 = arith.constant 0 : index
    %1 = vector.load %arg3[%c0_1, %c0_2] : memref<32x8xf32, #tpu.memory_space<vmem>>, vector<32x8xf32>
    %cst = arith.constant dense<0.000000e+00> : vector<8x8xf32>
    %2 = tpu.matmul %0, %1, %cst {dimension_numbers = #tpu.dot_dimension_numbers<[1], [0], [0], [1], [0, 0, 1, 1], [], []>} : vector<8x32xf32>, vector<32x8xf32>, vector<8x8xf32> -> vector<8x8xf32>
    %c0_3 = arith.constant 0 : index
    %c0_4 = arith.constant 0 : index
    %3 = vector.load %arg4[%c0_3, %c0_4] : memref<8x32xf32, #tpu.memory_space<vmem>>, vector<8x32xf32>
    %cst_5 = arith.constant dense<0.000000e+00> : vector<8x32xf32>
    %4 = tpu.matmul %2, %3, %cst_5 {dimension_numbers = #tpu.dot_dimension_numbers<[1], [0], [0], [1], [0, 0, 1, 1], [], []>} : vector<8x8xf32>, vector<8x32xf32>, vector<8x32xf32> -> vector<8x32xf32>
    %c0_6 = arith.constant 0 : index
    %c0_7 = arith.constant 0 : index
    %5 = vector.load %arg5[%c0_6, %c0_7] : memref<1x32xf32, #tpu.memory_space<vmem>>, vector<1x32xf32>
    %6 = vector.broadcast %5 : vector<1x32xf32> to vector<8x32xf32>
    %7 = arith.addf %4, %6 : vector<8x32xf32>
    %c0_8 = arith.constant 0 : index
    %c0_9 = arith.constant 0 : index
    %8 = vector.load %arg6[%c0_8, %c0_9] : memref<8x32xf32, #tpu.memory_space<vmem>>, vector<8x32xf32>
    tpu.vector_store %arg6[%c0_8, %c0_9], %7 {strides = array<i32>} : memref<8x32xf32, #tpu.memory_space<vmem>>, vector<8x32xf32>,
    return
  }
  func.func @transform_0(%arg0: i32, %arg1: i32) -> (i32, i32) {
    %c0_i32 = arith.constant 0 : i32
    %c0_i32_0 = arith.constant 0 : i32
    return %arg0, %c0_i32 : i32, i32
  }
  func.func @transform_1(%arg0: i32, %arg1: i32) -> (i32, i32) {
    %c0_i32 = arith.constant 0 : i32
    %c0_i32_0 = arith.constant 0 : i32
    %c0_i32_1 = arith.constant 0 : i32
    return %c0_i32, %c0_i32_0 : i32, i32
  }
  func.func @transform_2(%arg0: i32, %arg1: i32) -> (i32, i32) {
    %c0_i32 = arith.constant 0 : i32
    %c0_i32_0 = arith.constant 0 : i32
    return %c0_i32, %arg1 : i32, i32
  }
  func.func @transform_3(%arg0: i32, %arg1: i32) -> (i32, i32) {
    %c0_i32 = arith.constant 0 : i32
    %c0_i32_0 = arith.constant 0 : i32
    return %c0_i32, %arg1 : i32, i32
  }
  func.func @transform_4(%arg0: i32, %arg1: i32) -> (i32, i32) {
    %c0_i32 = arith.constant 0 : i32
    return %arg0, %arg1 : i32, i32
  }
}

</mosaic_0001>

<bundles_post_ra>
// kernel: tpu_custom_call.1
= control target key start
LH: loop header
LB: loop body
LE: loop exit
PB: predicated region body
PF: predicated region fallthrough
CT: control target
= control target key end

     0   :  { %9 = vsyncpa [#allocation3], 0  ;;  %s854_s0 = inlined_call_operand.vmem [shape: f32[16,32], index: 0, kind: input, shape index: {}]   ;;  %s855_s1 = inlined_call_operand.vmem [shape: f32[32,8], index: 1, kind: input, shape index: {}]   ;;  %s856_s2 = inlined_call_operand.vmem [shape: f32[8,32], index: 2, kind: input, shape index: {}]   ;;  %s857_s3 = inlined_call_operand.vmem [shape: f32[1,32], index: 3, kind: input, shape index: {}]   ;;  %s858_s4 = inlined_call_operand.hbm [shape: f32[16,32], index: 4, kind: output, shape index: {}]  }
   0x1   :  { %11 = vsyncpa [#allocation3 + $0x1], 0  ;;  %s722_s15 = smov 0   ;;  %s724_s16 = smov 0  }
   0x2   :  { %s726_s17 = smov 0   ;;  %s728_s18 = smov 0  }
   0x3   :  { %s730_s19 = smov 0   ;;  %s732_s20 = smov 0  }
   0x4 LB: > { %s510_s21 = sadd.s32 4294967295, %s691_s20   ;;  %s511_s22 = sadd.s32 4294967294, %s691_s20   ;;  %s691_s20 = sphi %s732_s20, %s17_s20   ;;  %s687_s19 = sphi %s730_s19, %s865_s19   ;;  %s683_s18 = sphi %s728_s18, %s864_s18   ;;  %s679_s17 = sphi %s726_s17, %s863_s17   ;;  %s675_s16 = sphi %s724_s16, %s862_s16   ;;  %s671_s15 = sphi %s722_s15, %s861_s15  }
   0x5   : > { %s29_s23 = sadd.s32 1, %s687_s19  ;;  %s137_s24 = sadd.s32 1, %s679_s17 }
   0x6   : > { %p31_p0 = scmp.ge.s32.totalorder %s29_s23, 2  ;;  %p147_p1 = scmp.ne.s32.totalorder %s679_s17, %s675_s16 }
   0x7   : > { %p148_p2 = scmp.eq.s32.totalorder %s510_s21, 1  ;;  %p153_p3 = scmp.ne.s32.totalorder %s675_s16, %s671_s15 }
   0x8   : > { %s867_s23 = smov (%p31_p0, %s29_s23), 0  ;;  %p154_p5 = scmp.eq.s32.totalorder %s511_s22, 1 }
   0x9   : > { %p762_p4 = por %p148_p2, %p147_p1  ;;  %s132_s26 = ssub.s32 %s687_s19, %s867_s23 }
   0xa   : > { %p516_p6 = scmp.ge.s32.totalorder %s691_s20, 1  ;;  %p135_p7 = scmp.eq.s32.totalorder %s132_s26, 0 }
   0xb   : > { %p769_p8 = por %p154_p5, %p153_p3  ;;  %p195_p9 = scmp.lt.s32.totalorder %s691_s20, 3 }
   0xc   : > { %s775_s28 = scalar_select %p135_p7, %s679_s17, %s137_s24  }
   0xd   : > { %p196_p10 = pnand %p516_p6, %p195_p9 }
   0xe   : > { %v239_v0 = vld [vmem:[%s855_s1] sm:$0xff] (!%p196_p10)  ;;  %v240_v1 = vld [vmem:[%s855_s1 + $0x8] sm:$0xff] (!%p196_p10)  ;;  %v241_v2 = vld [vmem:[%s855_s1 + $0x10] sm:$0xff] (!%p196_p10)  ;;  %v693_v3 = vmov (!%p196_p10), 0.0|0.0   ;;  %vm694_vm0 = vmmov (!%p196_p10), 0   ;;  %v695_v6 = vmov (!%p196_p10), 0.0  }
   0xf   : > { %199 = sbr.rel (%p196_p10) target bundleno = 467 (0x1d3), region = 36  ;;  %549 = vmatprep.subr.bf16.mxu0 (!%p196_p10), %v693_v3  ;;  %v550_v4 = vpack.c.bf16 (!%p196_p10), %v240_v1, %v239_v0  ;;  %v242_v5 = vld [vmem:[%s855_s1 + $0x18] sm:$0xff] (!%p196_p10)  ;;  %541 = vmatprep.mubr.msk.f32.mxu0 (!%p196_p10), %vm694_vm0, %v695_v6  ;;  %p227_p11 = scmp.lt.s32.totalorder (!%p196_p10), %s683_s18, 1  ;;  %vm243_vm1 = vcmask (!%p196_p10), 261120   ;;  %v317_v9 = vld [vmem:[%s856_s2] sm:$0xff] (!%p196_p10)  ;;  %vm325_vm2 = vcmask (!%p196_p10), 64512  }
  0x10   : > { %544 = vmatprep.subr.mxu1 (!%p196_p10), %v695_v6  ;;  %546 = vmatprep.mubr.msk.f32.mxu1 (!%p196_p10), %vm694_vm0, %v695_v6  ;;  %v553_v7 = vpack.c.bf16 (!%p196_p10), %v242_v5, %v241_v2  ;;  %s224_s26 = sand.u32 (!%p196_p10), 1, %s675_s16   ;;  %v520_v12 = vld [vmem:[%s857_s3] ss:$0 sm:$0xff] (!%p196_p10)  ;;  %s523_s6 = sshll.u32 (!%p196_p10), %s683_s18, 7 }
  0x11   : > { %551 = vmatpush3.bf16.msra.mxu0 (!%p196_p10), %v550_v4  ;;  %545 = vmatpush3.msra.mxu1 (!%p196_p10), %v317_v9  ;;  %s517_s29 = sshll.u32 (!%p196_p10), %s224_s26, 3 }
  0x12   : > { %552 = vmatprep.subr.bf16.mxu0 (!%p196_p10), %v693_v3  ;;  %s226_s7 = scalar_lea.vmem (!%p196_p10), [#allocation2], %s517_s29 }
  0x13   : > { %s415_s8 = sshll.u32 (!%p196_p10), %s226_s7, 4  ;;  %s808_s8 = int_to_ptr.vmem [resolvable:$true] %s415_s8 }
  0x14   : > { %s613_s13 = scalar_lea.vmem (!%p196_p10), %s808_s8, 128 }
  0x15   : > { %554 = vmatpush3.bf16.msra.mxu0 (!%p196_p10), %v553_v7  ;;  %p614_p12 = scmp.ne.s32.totalorder (!%p196_p10), %s808_s8, %s613_s13 }
  0x16   : > { %s228_s11 = scalar_select %p227_p11, %s683_s18, 1 }
  0x17   : > { %p615_p13 = pnand %p614_p12, %p762_p4  ;;  %s696_s18 = smov [#allocation2]  }
  0x18   : > { %s518_s12 = sshll.u32 %s228_s11, 3  ;;  %s806_s11 = scalar_lea.hbm %s858_s4, %s523_s6 }
  0x19   : > { %s230_s21 = scalar_lea.vmem %s854_s0, %s518_s12  ;;  %s401_s12 = scalar_lea.sflag [#allocation3], %s224_s26 }
  0x1a   : > { %v238_v8 = vld [vmem:[%s230_s21] sm:$0xff]  ;;  %p616_p0 = pneg %p615_p13  ;;  %s617_s14 = sshll.u32 %s696_s18, 4  ;;  %s618_s14 = int_to_ptr.vmem [resolvable:$false] %s617_s14 }
  0x1b   : > { %542 = vmatmul.mubr.msk.f32.vlgmr.msra.gmra.mrb[0].mxu0 %vm243_vm1, %v238_v8  ;;  %s619_s21 = scalar_lea.vmem %s618_s14, 256  ;;  %p620_p1 = scmp.lt.s32.totalorder %s808_s8, %s618_s14 }
  0x1c   : > { %p621_p2 = scmp.lt.s32.totalorder %s619_s21, %s613_s13 }
  0x1e   : > { %p622_p3 = por %p621_p2, %p620_p1 }
  0x20   : > { %p623_p5 = pnand %p622_p3, %p616_p0 }
  0xee   : > { %v313_v10 = vpop.f32.mrb[0].mxu0 }
  0xef   : > { %v543_v11 = vpop.f32.mrb[1].mxu0  ;;  %547 = vmatmul.mubr.msk.f32.vlgmr.msra.gmra.mrb[0].mxu1 %vm325_vm2, %v313_v10 }
 0x1c2   : > { %v395_v13 = vpop.f32.mrb[0].mxu1 }
 0x1c3   : > { %v396_v14 = vadd.f32 %v520_v12, %v395_v13  ;;  %v548_v15 = vpop.f32.mrb[1].mxu1 }
 0x1c5   : > { %399 = vst.msk [vmem:[%s226_s7] sm:$0xff] %vm243_vm1, %v396_v14 }
 0x1c6   : > { %626 = shalt.err (!%p623_p5)
}
 0x1c7   : > { %s627_s22 = scalar_lea.hbm %s806_s11, 128  ;;  %s631_s29 = scalar_lea.hbm %s858_s4, 256 }
 0x1c8   : > { %p628_p6 = scmp.ne.s32.totalorder %s806_s11, %s627_s22  ;;  %p632_p10 = scmp.lt.u32.totalorder %s806_s11, %s858_s4 }
 0x1c9   : > { %p633_p11 = scmp.lt.u32.totalorder %s631_s29, %s627_s22  ;;  %p635_p13 = scmp.lt.u32.totalorder %s627_s22, %s806_s11 }
 0x1ca   : > { %p629_p7 = pnand %p628_p6, %p762_p4 }
 0x1cb   : > { %p634_p12 = por %p633_p11, %p632_p10 }
 0x1cc   : > { %p630_p9 = pneg %p629_p7 }
 0x1cd   : > { %p636_p0 = por %p635_p13, %p634_p12 }
 0x1cf   : > { %p637_p1 = pnand %p636_p0, %p630_p9 }
 0x1d1   : > { %640 = shalt.err (!%p637_p1)
}
 0x1d2   : > { %555 = dma.vmem_to_hbm [thread:$0]  (%p762_p4), %s808_s8, 128, %s806_s11, %s401_s12  }
 0x1d3 PF: > { %p561_p2 = scmp.ge.s32.totalorder %s691_s20, 2  ;;  %s427_s6 = sand.u32 1, %s671_s15  }
 0x1d4   : > { %s428_s7 = scalar_lea.sflag [#allocation3], %s427_s6 }
 0x1d5   : > { %p558_p3 = pnand %p561_p2, %p769_p8 }
 0x1d7   : > { %666 = dma.done.wait (!%p558_p3), %s428_s7, 128  }
 0x1d8   : > { %668 = vsyncadd (!%p558_p3), %s428_s7, 4294967168  ;;  %s17_s20 = sadd.s32 1, %s691_s20   ;;  %s861_s15 = smov %s675_s16 }
 0x1d9   : > { %p14_p5 = scmp.ge.s32.totalorder %s17_s20, 4   ;;  %s862_s16 = smov %s679_s17 }
 0x1da   : > { %s863_s17 = smov %s775_s28  ;;  %s864_s18 = smov %s687_s19 }
 0x1db   : > { %s865_s19 = smov %s867_s23  ;;  %16 = sbr.rel (!%p14_p5) target bundleno = 4 (0x4), region = 77 }
 0x1e2   :  { %433 = vsyncpa [#allocation3], 1 }
 0x1e3   :  { %435 = vsyncpa [#allocation3 + $0x1], 1 }

</bundles_post_ra>
